<compile_context>
chip_gen: v7x
topology: tpu7x:2x2x1
jax: 0.10.0
libtpu: 0.0.40
codegen_flags: <defaults>
</compile_context>

<pallas_src>
import jax
import jax.numpy as jnp
from jax.experimental import pallas as pl
from jax.experimental.pallas import tpu as pltpu


def _dyn_sent_attn_kernel(scores_ref, reps_ref, out_ref):
    """Softmax over pre-masked scores + weighted sum, for one batch tile.

    scores_ref: (BT, N)    f32           scores with masked_fill already applied
    reps_ref:   (BT, N, D) native dtype  sentence representations
    out_ref:    (BT, D)    native dtype  attended representation per row
    """
    bt, n = scores_ref.shape
    d = reps_ref.shape[-1]

    # Row (sublane-axis) sub-tiling keeps the live (rows, N, D) f32 intermediate
    # bounded (~<=2 MiB) without any dynamic lane-axis slicing: static Python
    # loop, static slice starts, so everything folds to constants at lowering.
    max_live_f32 = (2 << 20) // 4
    rows = bt
    while rows > 8 and rows % 2 == 0 and rows * n * d > max_live_f32:
        rows //= 2

    for r0 in range(0, bt, rows):
        r1 = r0 + rows
        s = scores_ref[r0:r1, :].astype(jnp.float32)

        # numerically-stable softmax along N (matches F.softmax semantics)
        m = jnp.max(s, axis=-1, keepdims=True)
        e = jnp.exp(s - m)
        att = e / jnp.sum(e, axis=-1, keepdims=True)  # exact; kernel is HBM-bound

        # bmm(att.unsqueeze(1), reps).squeeze(1) == sum_n att[b,n] * reps[b,n,:]
        r = reps_ref[r0:r1, :, :].astype(jnp.float32)
        out = jnp.sum(att[:, :, None] * r, axis=1)

        # TODO(synk): when D < 128 and N is small this store is lane-sparse
        # (vst.msk); packing k rows per 128-lane output slab is skipped since
        # the output is only ~1/N of total HBM bytes here.
        out_ref[r0:r1, :] = out.astype(out_ref.dtype)


def _choose_b_tile(B, N, D, itemsize, target_bytes=8 << 20):
    """Batch-tile size: ~8 MiB of reps per grid step, multiple of 8 rows.

    No fixed row cap (cap on bytes, not rows). If the whole batch fits one
    block, optionally split into >= 2 grid steps so the parallel batch axis
    can shard across the two TensorCores on v7x -- but only when each half is
    still a non-overhead-dominated tile (>= ~2 MiB of reps).
    """
    row_bytes = max(1, N * D * itemsize)
    bt = max(8, (target_bytes // row_bytes) // 8 * 8)
    if bt >= B:
        bt = B  # single block covering the full batch
        if B >= 16 and (B // 2) * row_bytes >= (2 << 20):
            half = ((B // 2 + 7) // 8) * 8
            if 0 < half < B:
                bt = half
    return int(bt)


def _vmem_limit_bytes(needed_bytes):
    """Scoped-VMEM limit: cover the pipeline's needs, stay well under physical."""
    try:
        cap = int(pltpu.get_tpu_info().vmem_capacity_bytes)
    except Exception:
        cap = 64 << 20  # conservative fallback (v7x physical VMEM)
    hi = (cap * 3) // 4              # leave headroom for compiler scratch
    return int(min(max(needed_bytes, 32 << 20), hi))


def dynamic_sentence_attention(sentence_reps, sentence_mask, att_scores, valid_scores):
    """JAX/Pallas equivalent of DynamicSentenceAttention.forward (B > 0 path)."""
    B, N, D = sentence_reps.shape
    # TODO(synk): the PyTorch B == 0 branch (return sentence_reps[:, 0, :]) is a
    # degenerate empty-batch early-exit; not expressible as a TPU kernel launch.
    assert B > 0

    # Fold both masks into the scores here: a single f32 (B, N) stream enters
    # the kernel instead of scores + two int32 mask planes.
    mask = jnp.logical_and(sentence_mask, valid_scores)
    masked_scores = jnp.where(mask, att_scores.astype(jnp.float32),
                              jnp.float32(-10000.0))

    out_dtype = sentence_reps.dtype
    itemsize = sentence_reps.dtype.itemsize

    bt = _choose_b_tile(B, N, D, itemsize)
    grid = (pl.cdiv(B, bt),)

    # VMEM budget: double-buffered inputs/output + f32 intermediates headroom.
    reps_blk = bt * N * D * itemsize
    scores_blk = bt * N * 4
    out_blk = bt * D * itemsize
    needed = 2 * (reps_blk + scores_blk + out_blk) + (8 << 20)

    kernel = pl.pallas_call(
        _dyn_sent_attn_kernel,
        out_shape=jax.ShapeDtypeStruct((B, D), out_dtype),
        grid_spec=pltpu.PrefetchScalarGridSpec(
            num_scalar_prefetch=0,
            grid=grid,
            in_specs=[
                pl.BlockSpec((bt, N), lambda b: (b, 0)),        # pre-masked scores
                pl.BlockSpec((bt, N, D), lambda b: (b, 0, 0)),  # sentence_reps
            ],
            out_specs=pl.BlockSpec((bt, D), lambda b: (b, 0)),
        ),
        compiler_params=pltpu.CompilerParams(
            dimension_semantics=("parallel",),          # megacore / 2-TC sharding
            vmem_limit_bytes=_vmem_limit_bytes(needed),
        ),
    )
    # TODO(synk): padded rows of a partial last block see arbitrary buffer data;
    # their outputs are discarded (correct) but may show up in NaN-check tooling.
    return kernel(masked_scores, sentence_reps)


def init_params(key, input_size, proj_size):
    """Deterministic init mirroring DynamicSentenceAttention.__init__
    (REC_HID_SIZE=None branch). These params are unused by forward()."""
    k1, k2, k3, k4 = jax.random.split(key, 4)
    return {
        "att_proj": {
            "w": jax.random.normal(k1, (proj_size, input_size), jnp.float32) * 0.02,
            "b": jax.random.normal(k2, (proj_size,), jnp.float32) * 0.02,
        },
        "att_scorer": {
            "w": jax.random.normal(k3, (2, proj_size), jnp.float32) * 0.02,
            "b": jax.random.normal(k4, (2,), jnp.float32) * 0.02,
        },
    }


if __name__ == "__main__":
    # Small shapes consistent with the module: batch=2, N_sentence=8, INPUT_SIZE=32
    B, N, INPUT_SIZE, PROJ_SIZE = 2, 8, 32, 16

    key = jax.random.PRNGKey(0)
    k_reps, k_scores, k_mask, k_valid, k_params = jax.random.split(key, 5)

    _ = init_params(k_params, INPUT_SIZE, PROJ_SIZE)  # module params (unused in fwd)

    sentence_reps = jax.random.normal(k_reps, (B, N, INPUT_SIZE), jnp.float32)
    att_scores = jax.random.normal(k_scores, (B, N), jnp.float32)
    sentence_mask = jax.random.bernoulli(k_mask, 0.8, (B, N))
    valid_scores = jax.random.bernoulli(k_valid, 0.8, (B, N))
    # guarantee at least one valid sentence per batch row (as real data would)
    sentence_mask = sentence_mask.at[:, 0].set(True)
    valid_scores = valid_scores.at[:, 0].set(True)

    out = dynamic_sentence_attention(sentence_reps, sentence_mask, att_scores, valid_scores)
    out = jax.block_until_ready(out)

    # pure-JAX reference check (exact softmax in-kernel -> tight tolerance)
    m = jnp.logical_and(sentence_mask, valid_scores)
    ref_att = jax.nn.softmax(jnp.where(m, att_scores, -10000.0), axis=-1)
    ref = jnp.einsum("bn,bnd->bd", ref_att, sentence_reps)
    assert out.shape == (B, INPUT_SIZE)
    assert jnp.allclose(out, ref, atol=1e-5, rtol=1e-5)

    print("KERNEL_OK")
</pallas_src>

<mosaic_0001>
module attributes {stable_mosaic.version = 11 : i64} {
  func.func @_dyn_sent_attn_kernel(%arg0: i32, %arg1: memref<2x8xf32, #tpu.memory_space<vmem>>, %arg2: memref<2x8x32xf32, #tpu.memory_space<vmem>>, %arg3: memref<2x32xf32, #tpu.memory_space<vmem>>) attributes {dimension_semantics = [#tpu.dimension_semantics<parallel>], iteration_bounds = array<i64: 1>, scalar_prefetch = 0 : i64, scratch_operands = 0 : i64, tpu.core_type = #tpu.core_type<tc>, window_params = [{transform_indices = @transform_0, window_bounds = array<i64: 2, 8>}, {transform_indices = @transform_1, window_bounds = array<i64: 2, 8, 32>}, {transform_indices = @transform_2, window_bounds = array<i64: 2, 32>}]} {
    %c0 = arith.constant 0 : index
    %c0_0 = arith.constant 0 : index
    %0 = vector.load %arg1[%c0, %c0_0] : memref<2x8xf32, #tpu.memory_space<vmem>>, vector<2x8xf32>
    %cst = arith.constant dense<0xFF800000> : vector<2xf32>
    %1 = vector.multi_reduction <maximumf>, %0, %cst [1] : vector<2x8xf32> to vector<2xf32>
    %2 = vector.shape_cast %1 : vector<2xf32> to vector<2x1xf32>
    %3 = vector.broadcast %2 : vector<2x1xf32> to vector<2x8xf32>
    %4 = arith.subf %0, %3 : vector<2x8xf32>
    %5 = math.exp %4 : vector<2x8xf32>
    %cst_1 = arith.constant dense<0.000000e+00> : vector<2xf32>
    %6 = vector.multi_reduction <add>, %5, %cst_1 [1] : vector<2x8xf32> to vector<2xf32>
    %7 = vector.shape_cast %6 : vector<2xf32> to vector<2x1xf32>
    %8 = vector.broadcast %7 : vector<2x1xf32> to vector<2x8xf32>
    %9 = arith.divf %5, %8 : vector<2x8xf32>
    %c0_2 = arith.constant 0 : index
    %c0_3 = arith.constant 0 : index
    %c0_4 = arith.constant 0 : index
    %10 = vector.load %arg2[%c0_2, %c0_3, %c0_4] : memref<2x8x32xf32, #tpu.memory_space<vmem>>, vector<2x8x32xf32>
    %11 = vector.shape_cast %9 : vector<2x8xf32> to vector<2x8x1xf32>
    %12 = vector.broadcast %11 : vector<2x8x1xf32> to vector<2x8x32xf32>
    %13 = arith.mulf %12, %10 : vector<2x8x32xf32>
    %cst_5 = arith.constant dense<0.000000e+00> : vector<2x32xf32>
    %14 = vector.multi_reduction <add>, %13, %cst_5 [1] : vector<2x8x32xf32> to vector<2x32xf32>
    %c0_6 = arith.constant 0 : index
    %c0_7 = arith.constant 0 : index
    %15 = vector.load %arg3[%c0_6, %c0_7] : memref<2x32xf32, #tpu.memory_space<vmem>>, vector<2x32xf32>
    tpu.vector_store %arg3[%c0_6, %c0_7], %14 {strides = array<i32>} : memref<2x32xf32, #tpu.memory_space<vmem>>, vector<2x32xf32>,
    return
  }
  func.func @transform_0(%arg0: i32) -> (i32, i32) {
    %c0_i32 = arith.constant 0 : i32
    %c0_i32_0 = arith.constant 0 : i32
    return %arg0, %c0_i32 : i32, i32
  }
  func.func @transform_1(%arg0: i32) -> (i32, i32, i32) {
    %c0_i32 = arith.constant 0 : i32
    %c0_i32_0 = arith.constant 0 : i32
    %c0_i32_1 = arith.constant 0 : i32
    return %arg0, %c0_i32, %c0_i32_0 : i32, i32, i32
  }
  func.func @transform_2(%arg0: i32) -> (i32, i32) {
    %c0_i32 = arith.constant 0 : i32
    %c0_i32_0 = arith.constant 0 : i32
    return %arg0, %c0_i32 : i32, i32
  }
}

</mosaic_0001>

<bundles_post_ra>
// kernel: tpu_custom_call.1
= control target key start
LH: loop header
LB: loop body
LE: loop exit
PB: predicated region body
PF: predicated region fallthrough
CT: control target
= control target key end

     0   :  { %7 = vsyncpa [#allocation3], 0  ;;  %s251_s0 = inlined_call_operand.hbm [shape: f32[2,8], index: 0, kind: input, shape index: {}]   ;;  %s252_s1 = inlined_call_operand.hbm [shape: f32[2,8,32], index: 1, kind: input, shape index: {}]   ;;  %s253_s2 = inlined_call_operand.hbm [shape: f32[2,32], index: 2, kind: output, shape index: {}]  }
   0x1   :  { %8 = vsyncpa [#allocation6], 0 }
   0x2   :  { %9 = vsyncpa [#allocation4], 0  ;;  %s188_s9 = smov [#allocation2]   ;;  %s189_s11 = smov [#allocation5]  }
   0x3   :  { %s16_s10 = sshll.u32 %s188_s9, 4  ;;  %s25_s12 = sshll.u32 %s189_s11, 4  ;;  %s17_s10 = int_to_ptr.vmem [resolvable:$true] %s16_s10  ;;  %s208_s12 = int_to_ptr.vmem [resolvable:$true] %s25_s12 }
   0x4   :  { %s116_s15 = scalar_lea.hbm %s251_s0, 32 }
   0x5   :  { %p117_p0 = scmp.ne.s32.totalorder %s251_s0, %s116_s15  ;;  %p120_p1 = scmp.lt.u32.totalorder %s116_s15, %s251_s0 }
   0x7   :  { %p122_p2 = pnand %p120_p1, %p117_p0 }
   0x9   :  { %125 = shalt.err (!%p122_p2)
}
   0xa   :  { %s126_s20 = scalar_lea.vmem %s17_s10, 32  ;;  %p131_p4 = scmp.lt.s32.totalorder %s17_s10, %s17_s10 }
   0xb   :  { %p127_p3 = scmp.ne.s32.totalorder %s17_s10, %s126_s20  ;;  %p132_p5 = scmp.lt.s32.totalorder %s126_s20, %s126_s20 }
   0xd   :  { %p133_p6 = por %p132_p5, %p131_p4 }
   0xf   :  { %p134_p7 = pnand %p133_p6, %p127_p3 }
  0x11   :  { %137 = shalt.err (!%p134_p7)
}
  0x12   :  { %19 = dma.hbm_to_vmem [thread:$0]  %s251_s0, 32, %s17_s10, [#allocation3]  }
  0x13   :  { %s138_s25 = scalar_lea.hbm %s252_s1, 256 }
  0x14   :  { %p139_p8 = scmp.ne.s32.totalorder %s252_s1, %s138_s25  ;;  %p142_p9 = scmp.lt.u32.totalorder %s138_s25, %s252_s1 }
  0x16   :  { %p144_p10 = pnand %p142_p9, %p139_p8 }
  0x18   :  { %147 = shalt.err (!%p144_p10)
}
  0x19   :  { %s148_s30 = scalar_lea.vmem %s208_s12, 256  ;;  %p153_p12 = scmp.lt.s32.totalorder %s208_s12, %s208_s12 }
  0x1a   :  { %p149_p11 = scmp.ne.s32.totalorder %s208_s12, %s148_s30  ;;  %p154_p13 = scmp.lt.s32.totalorder %s148_s30, %s148_s30 }
  0x1c   :  { %p155_p0 = por %p154_p13, %p153_p12 }
  0x1e   :  { %p156_p1 = pnand %p155_p0, %p149_p11 }
  0x20   :  { %159 = shalt.err (!%p156_p1)
}
  0x21   :  { %s190_s0 = smov 128   ;;  %s191_s3 = smov 8  }
  0x22   :  { %31 = dma.hbm_to_vmem [thread:$0]  %s252_s1, 256, %s208_s12, [#allocation6], %s190_s0, %s190_s0, %s191_s3  }
  0x23   :  { %182 = dma.done.wait [#allocation3], 32  }
  0x24   :  { %183 = vsyncadd [#allocation3], 4294967264 }
  0x25   :  { %184 = dma.done.wait [#allocation6], 256  }
  0x26   :  { %185 = vsyncadd [#allocation6], 4294967040  ;;  %vm39_vm0 = vcmask 58368   ;;  %v38_v0 = vld [vmem:[#allocation2] sm:$0x3]  ;;  %v53_v8 = vlaneseq  ;;  %v51_v16 = vld [vmem:[#allocation5] sm:$0xff] }
  0x27   :  { %v40_v1 = vsel %vm39_vm0, %v38_v0, -inf  ;;  %vm69_vm1 = vcmask 261120   ;;  %v52_v19 = vld [vmem:[#allocation5 + $0x8] sm:$0xff]  ;;  %s192_s1 = smov [#allocation7]   ;;  %vm86_vm2 = vcmask 1041409   ;;  %vm89_vm3 = vcmask 254976  }
  0x28   :  { %41 = vmax.xlane.f32.xlu0 %v40_v1  ;;  %v54_v9 = vshrl.u32 %v53_v8, 7  ;;  %s97_s6 = sshll.u32 %s192_s1, 4  ;;  %s98_s6 = int_to_ptr.vmem [resolvable:$true] %s97_s6 }
  0x29   :  { %s160_s7 = scalar_lea.vmem %s98_s6, 32  ;;  %p165_p3 = scmp.lt.s32.totalorder %s98_s6, %s98_s6 }
  0x2a   :  { %v55_v10 = vsub.s32 0, %v54_v9  ;;  %v62_v14 = vsub.s32 1, %v54_v9  ;;  %p161_p2 = scmp.ne.s32.totalorder %s98_s6, %s160_s7  ;;  %p166_p4 = scmp.lt.s32.totalorder %s160_s7, %s160_s7 }
  0x2c   :  { %p167_p5 = por %p166_p4, %p165_p3 }
  0x2e   :  { %p168_p6 = pnand %p167_p5, %p161_p2 }
  0xb5   :  { %v42_v2 = vpop.xlane.xlu0 %41 }
  0xb6   :  { %v43_v3 = vsub.f32 %v38_v0, %v42_v2 }
  0xb8   :  { %v44_v4 = vmul.f32 1.442695, %v43_v3 }
  0xba   :  { %112 = vpow2.f32 %v44_v4 }
  0xc4   :  { %v113_v5 = vpop.eup %112 }
  0xc5   :  { %v46_v6 = vsel %vm39_vm0, %v113_v5, 0.0 }
  0xc6   :  { %47 = vadd.xlane.f32.xlu0 %v46_v6 }
 0x153   :  { %v48_v7 = vpop.xlane.xlu0 %47 }
 0x154   :  { %114 = vrcp.f32 %v48_v7 }
 0x15e   :  { %v115_v11 = vpop.eup %114 }
 0x15f   :  { %v50_v12 = vmul.f32 %v115_v11, %v113_v5 }
 0x161   :  { %v56_v13 = vrot.slane %v50_v12, %v55_v10  ;;  %v63_v15 = vrot.slane %v50_v12, %v62_v14 }
 0x163   :  { %58 = vbcast.lane.b32.xlu1 %v56_v13, 256 }
 0x167   :  { %65 = vbcast.lane.b32.xlu1 %v63_v15, 256 }
 0x1d5   :  { %v59_v17 = vpop.permute.xlu1 %58 }
 0x1d6   :  { %v67_v18 = vmul.f32 %v59_v17, %v51_v16 }
 0x1d8   :  { %v70_v20 = vsel %vm69_vm1, %v67_v18, 0.0 }
 0x1d9   :  { %v71_v21 = vrot.slane %v70_v20, 4  ;;  %v66_v22 = vpop.permute.xlu1 %65 }
 0x1da   :  { %v68_v23 = vmul.f32 %v66_v22, %v52_v19 }
 0x1db   :  { %v72_v24 = vadd.f32 %v71_v21, %v70_v20 }
 0x1dc   :  { %v77_v25 = vsel %vm69_vm1, %v68_v23, 0.0 }
 0x1dd   :  { %v73_v26 = vrot.slane %v72_v24, 2  ;;  %v78_v27 = vrot.slane %v77_v25, 4 }
 0x1df   :  { %v74_v28 = vadd.f32 %v73_v26, %v72_v24  ;;  %v79_v29 = vadd.f32 %v78_v27, %v77_v25 }
 0x1e1   :  { %v80_v30 = vrot.slane %v79_v29, 2  ;;  %v75_v31 = vrot.slane %v74_v28, 1 }
 0x1e3   :  { %v81_v32 = vadd.f32 %v80_v30, %v79_v29  ;;  %v76_v34 = vadd.f32 %v75_v31, %v74_v28 }
 0x1e5   :  { %v82_v33 = vrot.slane %v81_v32, 1 }
 0x1e7   :  { %v83_v35 = vadd.f32 %v82_v33, %v81_v32 }
 0x1e9   :  { %v87_v36 = vsel %vm86_vm2, %v83_v35, %v76_v34 }
 0x1ea   :  { %90 = vst.msk [vmem:[#allocation7] sm:$0x3] %vm89_vm3, %v87_v36 }
 0x1eb   :  { %171 = shalt.err (!%p168_p6)
}
 0x1ec   :  { %s172_s10 = scalar_lea.hbm %s253_s2, 32 }
 0x1ed   :  { %p173_p7 = scmp.ne.s32.totalorder %s253_s2, %s172_s10  ;;  %p176_p8 = scmp.lt.u32.totalorder %s172_s10, %s253_s2 }
 0x1ef   :  { %p178_p9 = pnand %p176_p8, %p173_p7 }
 0x1f1   :  { %181 = shalt.err (!%p178_p9)
}
 0x1f2   :  { %100 = dma.vmem_to_hbm [thread:$0]  %s98_s6, 32, %s253_s2, [#allocation4]  }
 0x1f3   :  { %186 = dma.done.wait [#allocation4], 32  }
 0x1f4   :  { %187 = vsyncadd [#allocation4], 4294967264 }
 0x1f5   :  { %104 = vsyncpa [#allocation3], 1 }
 0x1f6   :  { %105 = vsyncpa [#allocation6], 1 }
 0x1f7   :  { %106 = vsyncpa [#allocation4], 1 }

</bundles_post_ra>
